<compile_context>
chip_gen: v6e
topology: v6e:2x2x1
jax: 0.10.0
libtpu: 0.0.40
codegen_flags: <defaults>
</compile_context>

<pallas_src>
import functools

import numpy as np
import jax
import jax.numpy as jnp
from jax.experimental import pallas as pl
from jax.experimental.pallas import tpu as pltpu


# ---------------------------------------------------------------------------
# in-kernel math helpers
# ---------------------------------------------------------------------------
def _gelu_exact(x):
    """erf-based GELU (PyTorch nn.GELU() default, approximate='none').

    Uses the Abramowitz & Stegun 7.1.26 erf polynomial (|err| < 1.5e-7) since
    lax.erf has no Mosaic lowering; exp() goes to the EUP slot.
    """
    a1, a2, a3, a4, a5 = 0.254829592, -0.284496736, 1.421413741, -1.453152027, 1.061405429
    p = 0.3275911
    z = x * 0.7071067811865476          # x / sqrt(2)
    s = jnp.where(z >= 0.0, 1.0, -1.0)
    az = jnp.abs(z)
    t = 1.0 / (1.0 + p * az)
    poly = ((((a5 * t + a4) * t + a3) * t + a2) * t + a1) * t
    erf_z = s * (1.0 - poly * jnp.exp(-az * az))
    return 0.5 * x * (1.0 + erf_z)


# ---------------------------------------------------------------------------
# fused MLP kernel:  out = fc2(gelu(fc1(x)))
# grid = (row tiles, hidden tiles); the hidden axis is a reduction into acc_ref.
# ---------------------------------------------------------------------------
def _mlp_kernel(x_ref, w1_ref, b1_ref, w2_ref, b2_ref, o_ref, acc_ref, *, use_bf16):
    j = pl.program_id(1)

    @pl.when(j == 0)
    def _():
        acc_ref[...] = jnp.zeros_like(acc_ref)

    x = x_ref[...].astype(jnp.float32)
    w1 = w1_ref[...]
    w2 = w2_ref[...]
    if use_bf16:                                   # static flag
        x = x.astype(jnp.bfloat16)
        w1 = w1.astype(jnp.bfloat16)

    h = jnp.dot(x, w1, preferred_element_type=jnp.float32) + b1_ref[...]   # (tm, th)
    h = _gelu_exact(h)

    if use_bf16:
        h = h.astype(jnp.bfloat16)
        w2 = w2.astype(jnp.bfloat16)

    acc_ref[...] += jnp.dot(h, w2, preferred_element_type=jnp.float32)     # (tm, C_out)

    @pl.when(j == pl.num_programs(1) - 1)
    def _():
        o_ref[...] = (acc_ref[...] + b2_ref[...]).astype(o_ref.dtype)


def mlp_forward(x, w1, b1, w2, b2, *, block_rows=512, block_hidden=512, use_bf16=False):
    """x: (..., C_in); w1: (C_in, hidden) = fc1.weight.T; w2: (hidden, C_out) = fc2.weight.T."""
    C_in, hidden = w1.shape
    hidden2, C_out = w2.shape
    assert hidden2 == hidden and x.shape[-1] == C_in

    lead_shape = x.shape[:-1]
    x2d = x.reshape(-1, C_in)
    M = x2d.shape[0]

    # --- row tile: multiple of 8 sublanes, pad M up to a whole number of tiles
    tm = max(8, (min(block_rows, M) // 8) * 8)
    n_row_tiles = pl.cdiv(M, tm)
    Mp = n_row_tiles * tm
    if Mp != M:
        x2d = jnp.pad(x2d, ((0, Mp - M), (0, 0)))

    # --- hidden tile: a lane-aligned (multiple-of-128) divisor of `hidden`
    th = hidden
    if hidden > block_hidden and hidden % 128 == 0:
        for cand in range((block_hidden // 128) * 128, 127, -128):
            if hidden % cand == 0:
                th = cand
                break
    n_hid_tiles = hidden // th

    kernel = functools.partial(_mlp_kernel, use_bf16=use_bf16)
    out = pl.pallas_call(
        kernel,
        out_shape=jax.ShapeDtypeStruct((Mp, C_out), x.dtype),
        grid=(n_row_tiles, n_hid_tiles),
        in_specs=[
            pl.BlockSpec((tm, C_in), lambda i, j: (i, 0)),   # activation row tile
            pl.BlockSpec((C_in, th), lambda i, j: (0, j)),   # fc1 weight slice
            pl.BlockSpec((1, th),   lambda i, j: (0, j)),    # fc1 bias slice
            pl.BlockSpec((th, C_out), lambda i, j: (j, 0)),  # fc2 weight slice
            pl.BlockSpec((1, C_out), lambda i, j: (0, 0)),   # fc2 bias (resident)
        ],
        out_specs=pl.BlockSpec((tm, C_out), lambda i, j: (i, 0)),
        scratch_shapes=[pltpu.VMEM((tm, C_out), jnp.float32)],
        compiler_params=pltpu.CompilerParams(
            dimension_semantics=("parallel", "arbitrary")),
    )(x2d, w1, b1.reshape(1, hidden), w2, b2.reshape(1, C_out))

    if Mp != M:
        out = out[:M]
    return out.reshape(*lead_shape, C_out)


# ---------------------------------------------------------------------------
# pure-JAX reference (exact erf GELU, same as torch nn.GELU default)
# ---------------------------------------------------------------------------
def mlp_reference(x, w1, b1, w2, b2):
    h = jnp.dot(x, w1) + b1
    h = 0.5 * h * (1.0 + jax.lax.erf(h * 0.7071067811865476))
    return jnp.dot(h, w2) + b2


if __name__ == "__main__":
    key = jax.random.PRNGKey(0)
    k = jax.random.split(key, 8)

    # ---- Test 1: typical transformer-MLP shapes, hidden = 4 * in_features ----
    B, L, C, Hd = 2, 64, 32, 128
    x = jax.random.normal(k[0], (B, L, C), jnp.float32)
    w1 = jax.random.normal(k[1], (C, Hd), jnp.float32) * 0.02   # = fc1.weight.T
    b1 = jax.random.normal(k[2], (Hd,), jnp.float32) * 0.02
    w2 = jax.random.normal(k[3], (Hd, C), jnp.float32) * 0.02   # = fc2.weight.T
    b2 = jax.random.normal(k[4], (C,), jnp.float32) * 0.02

    out = jax.block_until_ready(mlp_forward(x, w1, b1, w2, b2))
    ref = mlp_reference(x, w1, b1, w2, b2)
    assert out.shape == (B, L, C) and out.dtype == jnp.float32
    np.testing.assert_allclose(np.asarray(out), np.asarray(ref), atol=1e-4, rtol=1e-4)

    # ---- Test 2: exercises row padding (M=21) and hidden-dimension tiling ----
    x2 = jax.random.normal(k[5], (3, 7, 64), jnp.float32)
    w1b = jax.random.normal(k[6], (64, 256), jnp.float32) * 0.02
    b1b = jnp.full((256,), 0.01, jnp.float32)
    w2b = jax.random.normal(k[7], (256, 64), jnp.float32) * 0.02
    b2b = jnp.full((64,), -0.01, jnp.float32)
    out2 = jax.block_until_ready(
        mlp_forward(x2, w1b, b1b, w2b, b2b, block_rows=16, block_hidden=128))
    ref2 = mlp_reference(x2, w1b, b1b, w2b, b2b)
    assert out2.shape == (3, 7, 64)
    np.testing.assert_allclose(np.asarray(out2), np.asarray(ref2), atol=1e-4, rtol=1e-4)

    # TODO(synk): nn.Dropout is identity at inference / p=0.0; no RNG dropout is emitted.
    print("KERNEL_OK")
</pallas_src>

<mosaic_0001>
module attributes {stable_mosaic.version = 11 : i64} {
  func.func @_mlp_kernel(%arg0: i32, %arg1: i32, %arg2: memref<128x32xf32, #tpu.memory_space<vmem>>, %arg3: memref<32x128xf32, #tpu.memory_space<vmem>>, %arg4: memref<1x128xf32, #tpu.memory_space<vmem>>, %arg5: memref<128x32xf32, #tpu.memory_space<vmem>>, %arg6: memref<1x32xf32, #tpu.memory_space<vmem>>, %arg7: memref<128x32xf32, #tpu.memory_space<vmem>>, %arg8: memref<128x32xf32, #tpu.memory_space<vmem>>) attributes {dimension_semantics = [#tpu.dimension_semantics<parallel>, #tpu.dimension_semantics<arbitrary>], iteration_bounds = array<i64: 1, 1>, scalar_prefetch = 0 : i64, scratch_operands = 1 : i64, tpu.core_type = #tpu.core_type<tc>, window_params = [{transform_indices = @transform_0, window_bounds = array<i64: 128, 32>}, {transform_indices = @transform_1, window_bounds = array<i64: 32, 128>}, {transform_indices = @transform_2, window_bounds = array<i64: 1, 128>}, {transform_indices = @transform_3, window_bounds = array<i64: 128, 32>}, {pipeline_mode = #tpu.pipeline_mode<synchronous>, transform_indices = @transform_4, window_bounds = array<i64: 1, 32>}, {transform_indices = @transform_5, window_bounds = array<i64: 128, 32>}]} {
    %c0_i32 = arith.constant 0 : i32
    %0 = arith.cmpi eq, %arg1, %c0_i32 : i32
    %1 = arith.extui %0 : i1 to i32
    %c0_i32_0 = arith.constant 0 : i32
    %2 = arith.cmpi ne, %1, %c0_i32_0 : i32
    scf.if %2 {
      %cst_31 = arith.constant 0.000000e+00 : f32
      %58 = vector.broadcast %cst_31 : f32 to vector<128x32xf32>
      %c0_32 = arith.constant 0 : index
      %c0_33 = arith.constant 0 : index
      %59 = vector.load %arg8[%c0_32, %c0_33] : memref<128x32xf32, #tpu.memory_space<vmem>>, vector<128x32xf32>
      tpu.vector_store %arg8[%c0_32, %c0_33], %58 {strides = array<i32>} : memref<128x32xf32, #tpu.memory_space<vmem>>, vector<128x32xf32>,
    } else {
    }
    %c0 = arith.constant 0 : index
    %c0_1 = arith.constant 0 : index
    %3 = vector.load %arg2[%c0, %c0_1] : memref<128x32xf32, #tpu.memory_space<vmem>>, vector<128x32xf32>
    %c0_2 = arith.constant 0 : index
    %c0_3 = arith.constant 0 : index
    %4 = vector.load %arg3[%c0_2, %c0_3] : memref<32x128xf32, #tpu.memory_space<vmem>>, vector<32x128xf32>
    %c0_4 = arith.constant 0 : index
    %c0_5 = arith.constant 0 : index
    %5 = vector.load %arg5[%c0_4, %c0_5] : memref<128x32xf32, #tpu.memory_space<vmem>>, vector<128x32xf32>
    %cst = arith.constant dense<0.000000e+00> : vector<128x128xf32>
    %6 = tpu.matmul %3, %4, %cst {dimension_numbers = #tpu.dot_dimension_numbers<[1], [0], [0], [1], [0, 0, 1, 1], [], []>} : vector<128x32xf32>, vector<32x128xf32>, vector<128x128xf32> -> vector<128x128xf32>
    %c0_6 = arith.constant 0 : index
    %c0_7 = arith.constant 0 : index
    %7 = vector.load %arg4[%c0_6, %c0_7] : memref<1x128xf32, #tpu.memory_space<vmem>>, vector<1x128xf32>
    %8 = vector.broadcast %7 : vector<1x128xf32> to vector<128x128xf32>
    %9 = arith.addf %6, %8 : vector<128x128xf32>
    %cst_8 = arith.constant 0.707106769 : f32
    %10 = vector.broadcast %cst_8 : f32 to vector<128x128xf32>
    %11 = arith.mulf %9, %10 : vector<128x128xf32>
    %cst_9 = arith.constant 0.000000e+00 : f32
    %12 = vector.broadcast %cst_9 : f32 to vector<128x128xf32>
    %13 = arith.cmpf oge, %11, %12 : vector<128x128xf32>
    %cst_10 = arith.constant 1.000000e+00 : f32
    %cst_11 = arith.constant -1.000000e+00 : f32
    %14 = vector.broadcast %cst_10 : f32 to vector<128x128xf32>
    %15 = vector.broadcast %cst_11 : f32 to vector<128x128xf32>
    %16 = arith.select %13, %14, %15 : vector<128x128xi1>, vector<128x128xf32>
    %17 = math.absf %11 : vector<128x128xf32>
    %cst_12 = arith.constant 0.327591091 : f32
    %18 = vector.broadcast %cst_12 : f32 to vector<128x128xf32>
    %19 = arith.mulf %18, %17 : vector<128x128xf32>
    %cst_13 = arith.constant 1.000000e+00 : f32
    %20 = vector.broadcast %cst_13 : f32 to vector<128x128xf32>
    %21 = arith.addf %20, %19 : vector<128x128xf32>
    %cst_14 = arith.constant 1.000000e+00 : f32
    %22 = vector.broadcast %cst_14 : f32 to vector<128x128xf32>
    %23 = arith.divf %22, %21 : vector<128x128xf32>
    %cst_15 = arith.constant 1.06140542 : f32
    %24 = vector.broadcast %cst_15 : f32 to vector<128x128xf32>
    %25 = arith.mulf %24, %23 : vector<128x128xf32>
    %cst_16 = arith.constant -1.45315206 : f32
    %26 = vector.broadcast %cst_16 : f32 to vector<128x128xf32>
    %27 = arith.addf %25, %26 : vector<128x128xf32>
    %28 = arith.mulf %27, %23 : vector<128x128xf32>
    %cst_17 = arith.constant 1.42141378 : f32
    %29 = vector.broadcast %cst_17 : f32 to vector<128x128xf32>
    %30 = arith.addf %28, %29 : vector<128x128xf32>
    %31 = arith.mulf %30, %23 : vector<128x128xf32>
    %cst_18 = arith.constant -0.284496725 : f32
    %32 = vector.broadcast %cst_18 : f32 to vector<128x128xf32>
    %33 = arith.addf %31, %32 : vector<128x128xf32>
    %34 = arith.mulf %33, %23 : vector<128x128xf32>
    %cst_19 = arith.constant 0.254829586 : f32
    %35 = vector.broadcast %cst_19 : f32 to vector<128x128xf32>
    %36 = arith.addf %34, %35 : vector<128x128xf32>
    %37 = arith.mulf %36, %23 : vector<128x128xf32>
    %cst_20 = arith.constant 0.000000e+00 : f32
    %38 = vector.broadcast %cst_20 : f32 to vector<128x128xf32>
    %39 = arith.subf %38, %17 : vector<128x128xf32>
    %40 = arith.mulf %39, %17 : vector<128x128xf32>
    %41 = math.exp %40 : vector<128x128xf32>
    %42 = arith.mulf %37, %41 : vector<128x128xf32>
    %cst_21 = arith.constant 1.000000e+00 : f32
    %43 = vector.broadcast %cst_21 : f32 to vector<128x128xf32>
    %44 = arith.subf %43, %42 : vector<128x128xf32>
    %45 = arith.mulf %16, %44 : vector<128x128xf32>
    %cst_22 = arith.constant 5.000000e-01 : f32
    %46 = vector.broadcast %cst_22 : f32 to vector<128x128xf32>
    %47 = arith.mulf %46, %9 : vector<128x128xf32>
    %cst_23 = arith.constant 1.000000e+00 : f32
    %48 = vector.broadcast %cst_23 : f32 to vector<128x128xf32>
    %49 = arith.addf %48, %45 : vector<128x128xf32>
    %50 = arith.mulf %47, %49 : vector<128x128xf32>
    %c0_24 = arith.constant 0 : index
    %c0_25 = arith.constant 0 : index
    %51 = vector.load %arg8[%c0_24, %c0_25] : memref<128x32xf32, #tpu.memory_space<vmem>>, vector<128x32xf32>
    %cst_26 = arith.constant dense<0.000000e+00> : vector<128x32xf32>
    %52 = tpu.matmul %50, %5, %cst_26 {dimension_numbers = #tpu.dot_dimension_numbers<[1], [0], [0], [1], [0, 0, 1, 1], [], []>} : vector<128x128xf32>, vector<128x32xf32>, vector<128x32xf32> -> vector<128x32xf32>
    %53 = arith.addf %51, %52 : vector<128x32xf32>
    %c0_27 = arith.constant 0 : index
    %c0_28 = arith.constant 0 : index
    %54 = vector.load %arg8[%c0_27, %c0_28] : memref<128x32xf32, #tpu.memory_space<vmem>>, vector<128x32xf32>
    tpu.vector_store %arg8[%c0_27, %c0_28], %53 {strides = array<i32>} : memref<128x32xf32, #tpu.memory_space<vmem>>, vector<128x32xf32>,
    %c0_i32_29 = arith.constant 0 : i32
    %55 = arith.cmpi eq, %arg1, %c0_i32_29 : i32
    %56 = arith.extui %55 : i1 to i32
    %c0_i32_30 = arith.constant 0 : i32
    %57 = arith.cmpi ne, %56, %c0_i32_30 : i32
    scf.if %57 {
      %c0_31 = arith.constant 0 : index
      %c0_32 = arith.constant 0 : index
      %58 = vector.load %arg8[%c0_31, %c0_32] : memref<128x32xf32, #tpu.memory_space<vmem>>, vector<128x32xf32>
      %c0_33 = arith.constant 0 : index
      %c0_34 = arith.constant 0 : index
      %59 = vector.load %arg6[%c0_33, %c0_34] : memref<1x32xf32, #tpu.memory_space<vmem>>, vector<1x32xf32>
      %60 = vector.broadcast %59 : vector<1x32xf32> to vector<128x32xf32>
      %61 = arith.addf %58, %60 : vector<128x32xf32>
      %c0_35 = arith.constant 0 : index
      %c0_36 = arith.constant 0 : index
      %62 = vector.load %arg7[%c0_35, %c0_36] : memref<128x32xf32, #tpu.memory_space<vmem>>, vector<128x32xf32>
      tpu.vector_store %arg7[%c0_35, %c0_36], %61 {strides = array<i32>} : memref<128x32xf32, #tpu.memory_space<vmem>>, vector<128x32xf32>,
    } else {
    }
    return
  }
  func.func @transform_0(%arg0: i32, %arg1: i32) -> (i32, i32) {
    %c0_i32 = arith.constant 0 : i32
    %c0_i32_0 = arith.constant 0 : i32
    return %arg0, %c0_i32 : i32, i32
  }
  func.func @transform_1(%arg0: i32, %arg1: i32) -> (i32, i32) {
    %c0_i32 = arith.constant 0 : i32
    %c0_i32_0 = arith.constant 0 : i32
    return %c0_i32, %arg1 : i32, i32
  }
  func.func @transform_2(%arg0: i32, %arg1: i32) -> (i32, i32) {
    %c0_i32 = arith.constant 0 : i32
    %c0_i32_0 = arith.constant 0 : i32
    return %c0_i32, %arg1 : i32, i32
  }
  func.func @transform_3(%arg0: i32, %arg1: i32) -> (i32, i32) {
    %c0_i32 = arith.constant 0 : i32
    %c0_i32_0 = arith.constant 0 : i32
    return %arg1, %c0_i32 : i32, i32
  }
  func.func @transform_4(%arg0: i32, %arg1: i32) -> (i32, i32) {
    %c0_i32 = arith.constant 0 : i32
    %c0_i32_0 = arith.constant 0 : i32
    %c0_i32_1 = arith.constant 0 : i32
    return %c0_i32, %c0_i32_0 : i32, i32
  }
  func.func @transform_5(%arg0: i32, %arg1: i32) -> (i32, i32) {
    %c0_i32 = arith.constant 0 : i32
    %c0_i32_0 = arith.constant 0 : i32
    return %arg0, %c0_i32 : i32, i32
  }
}

</mosaic_0001>

<bundles_post_ra>
// kernel: tpu_custom_call.1
= control target key start
LH: loop header
LB: loop body
LE: loop exit
PB: predicated region body
PF: predicated region fallthrough
CT: control target
= control target key end

     0   :  { %vm24_vm0 = vcmask 261120   ;;  %v1221_v36 = vmov 0.0   ;;  %s1850_s1 = inlined_call_operand.vmem [shape: f32[32,128], index: 1, kind: input, shape index: {}]   ;;  %s1851_s0 = inlined_call_operand.vmem [shape: f32[128,32], index: 0, kind: input, shape index: {}]   ;;  %s1852_s3 = inlined_call_operand.vmem [shape: f32[128,32], index: 3, kind: input, shape index: {}]   ;;  %s1853_s2 = inlined_call_operand.vmem [shape: f32[1,128], index: 2, kind: input, shape index: {}]   ;;  %s1854_s4 = inlined_call_operand.vmem [shape: f32[1,32], index: 4, kind: input, shape index: {}]   ;;  %s1855_s5 = inlined_call_operand.vmem [shape: f32[128,32], index: 5, kind: output, shape index: {}]  }
   0x1   :  { %v60_v0 = vld [vmem:[%s1850_s1 + $0x18] sm:$0xff]  ;;  %v59_v1 = vld [vmem:[%s1850_s1 + $0x10] sm:$0xff]  ;;  %v41_v2 = vld [vmem:[%s1851_s0] sm:$0xff]  ;;  %26 = vst.msk [vmem:[#allocation2 + $0x8] sm:$0xff] %vm24_vm0, %v1221_v36 }
   0x2   :  { %1035 = vmatprep.subr.mxu0 %v60_v0  ;;  %v58_v3 = vld [vmem:[%s1850_s1 + $0x8] sm:$0xff]  ;;  %1043 = vmatprep.mubr.msk.f32.mxu0 %vm24_vm0, %v41_v2  ;;  %v57_v4 = vld [vmem:[%s1850_s1] sm:$0xff]  ;;  %v43_v6 = vld [vmem:[%s1851_s0 + $0x10] sm:$0xff]  ;;  %25 = vst.msk [vmem:[#allocation2] sm:$0xff] %vm24_vm0, %v1221_v36 }
   0x3   :  { %1036 = vmatpush3.msra.mxu0 %v60_v0  ;;  %v42_v5 = vld [vmem:[%s1851_s0 + $0x8] sm:$0xff]  ;;  %v44_v7 = vld [vmem:[%s1851_s0 + $0x18] sm:$0xff]  ;;  %v45_v8 = vld [vmem:[%s1851_s0 + $0x20] sm:$0xff]  ;;  %27 = vst.msk [vmem:[#allocation2 + $0x10] sm:$0xff] %vm24_vm0, %v1221_v36 }
   0x4   :  { %1037 = vmatprep.subr.mxu0 %v59_v1  ;;  %v46_v9 = vld [vmem:[%s1851_s0 + $0x28] sm:$0xff]  ;;  %v47_v10 = vld [vmem:[%s1851_s0 + $0x30] sm:$0xff]  ;;  %v48_v11 = vld [vmem:[%s1851_s0 + $0x38] sm:$0xff]  ;;  %28 = vst.msk [vmem:[#allocation2 + $0x18] sm:$0xff] %vm24_vm0, %v1221_v36 }
   0x5   :  { %1038 = vmatpush3.msra.mxu0 %v59_v1  ;;  %v49_v12 = vld [vmem:[%s1851_s0 + $0x40] sm:$0xff]  ;;  %v50_v13 = vld [vmem:[%s1851_s0 + $0x48] sm:$0xff]  ;;  %v51_v14 = vld [vmem:[%s1851_s0 + $0x50] sm:$0xff]  ;;  %29 = vst.msk [vmem:[#allocation2 + $0x20] sm:$0xff] %vm24_vm0, %v1221_v36 }
   0x6   :  { %1039 = vmatprep.subr.mxu0 %v58_v3  ;;  %v52_v15 = vld [vmem:[%s1851_s0 + $0x58] sm:$0xff]  ;;  %v53_v16 = vld [vmem:[%s1851_s0 + $0x60] sm:$0xff]  ;;  %v54_v17 = vld [vmem:[%s1851_s0 + $0x68] sm:$0xff]  ;;  %30 = vst.msk [vmem:[#allocation2 + $0x28] sm:$0xff] %vm24_vm0, %v1221_v36 }
   0x7   :  { %1040 = vmatpush3.msra.mxu0 %v58_v3  ;;  %v55_v18 = vld [vmem:[%s1851_s0 + $0x70] sm:$0xff]  ;;  %v56_v19 = vld [vmem:[%s1851_s0 + $0x78] sm:$0xff]  ;;  %v74_v22 = vld [vmem:[%s1852_s3 + $0x68] sm:$0xff]  ;;  %31 = vst.msk [vmem:[#allocation2 + $0x30] sm:$0xff] %vm24_vm0, %v1221_v36 }
   0x8   :  { %1041 = vmatprep.subr.mxu0 %v57_v4  ;;  %v76_v20 = vld [vmem:[%s1852_s3 + $0x78] sm:$0xff]  ;;  %v75_v21 = vld [vmem:[%s1852_s3 + $0x70] sm:$0xff]  ;;  %v73_v23 = vld [vmem:[%s1852_s3 + $0x60] sm:$0xff]  ;;  %32 = vst.msk [vmem:[#allocation2 + $0x38] sm:$0xff] %vm24_vm0, %v1221_v36 }
   0x9   :  { %1042 = vmatpush3.msra.mxu0 %v57_v4  ;;  %1123 = vmatprep.subr.mxu1 %v76_v20  ;;  %v72_v24 = vld [vmem:[%s1852_s3 + $0x58] sm:$0xff]  ;;  %v71_v25 = vld [vmem:[%s1852_s3 + $0x50] sm:$0xff]  ;;  %v70_v26 = vld [vmem:[%s1852_s3 + $0x48] sm:$0xff]  ;;  %33 = vst.msk [vmem:[#allocation2 + $0x40] sm:$0xff] %vm24_vm0, %v1221_v36 }
   0xa   :  { %1044 = vmatmul.mubr.msk.f32.vlgmr.msra.gmra.mxu0 %vm24_vm0, %v42_v5  ;;  %1067 = vmatprep.subr.mxu0 %v76_v20  ;;  %v69_v27 = vld [vmem:[%s1852_s3 + $0x40] sm:$0xff]  ;;  %v68_v28 = vld [vmem:[%s1852_s3 + $0x38] sm:$0xff]  ;;  %v67_v29 = vld [vmem:[%s1852_s3 + $0x30] sm:$0xff]  ;;  %34 = vst.msk [vmem:[#allocation2 + $0x48] sm:$0xff] %vm24_vm0, %v1221_v36  ;;  %v1856_v5 = vmov -1.0  }
   0xb   :  { %1046 = vmatprep.mubr.msk.f32.mxu0 %vm24_vm0, %v43_v6  ;;  %1068 = vmatpush3.msra.mxu0 %v76_v20  ;;  %v66_v30 = vld [vmem:[%s1852_s3 + $0x28] sm:$0xff]  ;;  %v65_v31 = vld [vmem:[%s1852_s3 + $0x20] sm:$0xff]  ;;  %v64_v32 = vld [vmem:[%s1852_s3 + $0x18] sm:$0xff]  ;;  %35 = vst.msk [vmem:[#allocation2 + $0x50] sm:$0xff] %vm24_vm0, %v1221_v36 }
   0xc   :  { %1139 = vmatpush3.msra.mxu1 %v76_v20  ;;  %1069 = vmatprep.subr.mxu0 %v75_v21  ;;  %v63_v33 = vld [vmem:[%s1852_s3 + $0x10] sm:$0xff]  ;;  %v62_v34 = vld [vmem:[%s1852_s3 + $0x8] sm:$0xff]  ;;  %v61_v35 = vld [vmem:[%s1852_s3] sm:$0xff]  ;;  %36 = vst.msk [vmem:[#allocation2 + $0x58] sm:$0xff] %vm24_vm0, %v1221_v36 }
   0xd   :  { %1124 = vmatprep.subr.mxu1 %v75_v21  ;;  %1070 = vmatpush3.msra.mxu0 %v75_v21  ;;  %37 = vst.msk [vmem:[#allocation2 + $0x60] sm:$0xff] %vm24_vm0, %v1221_v36  ;;  %38 = vst.msk [vmem:[#allocation2 + $0x68] sm:$0xff] %vm24_vm0, %v1221_v36  ;;  %v1396_v37 = vld [vmem:[%s1853_s2] ss:$0 sm:$0xff] }
   0xe   :  { %1047 = vmatmul.mubr.msk.f32.gmra.mxu0 %vm24_vm0, %v44_v7  ;;  %1140 = vmatpush3.msra.mxu1 %v75_v21  ;;  %39 = vst.msk [vmem:[#allocation2 + $0x70] sm:$0xff] %vm24_vm0, %v1221_v36  ;;  %40 = vst.msk [vmem:[#allocation2 + $0x78] sm:$0xff] %vm24_vm0, %v1221_v36 }
   0xf   :  { %1049 = vmatprep.mubr.msk.f32.mxu0 %vm24_vm0, %v45_v8  ;;  %1071 = vmatprep.subr.mxu0 %v74_v22 }
  0x10   :  { %1125 = vmatprep.subr.mxu1 %v74_v22  ;;  %1072 = vmatpush3.msra.mxu0 %v74_v22 }
  0x11   :  { %1141 = vmatpush3.msra.mxu1 %v74_v22  ;;  %1073 = vmatprep.subr.mxu0 %v73_v23 }
  0x12   :  { %1050 = vmatmul.mubr.msk.f32.gmra.mxu0 %vm24_vm0, %v46_v9  ;;  %1126 = vmatprep.subr.mxu1 %v73_v23 }
  0x13   :  { %1052 = vmatprep.mubr.msk.f32.mxu0 %vm24_vm0, %v47_v10  ;;  %1074 = vmatpush3.msra.mxu0 %v73_v23 }
  0x14   :  { %1142 = vmatpush3.msra.mxu1 %v73_v23  ;;  %1075 = vmatprep.subr.mxu0 %v72_v24 }
  0x15   :  { %1127 = vmatprep.subr.mxu1 %v72_v24  ;;  %1076 = vmatpush3.msra.mxu0 %v72_v24 }
  0x16   :  { %1053 = vmatmul.mubr.msk.f32.gmra.mxu0 %vm24_vm0, %v48_v11  ;;  %1143 = vmatpush3.msra.mxu1 %v72_v24 }
  0x17   :  { %1055 = vmatprep.mubr.msk.f32.mxu0 %vm24_vm0, %v49_v12  ;;  %1077 = vmatprep.subr.mxu0 %v71_v25 }
  0x18   :  { %1128 = vmatprep.subr.mxu1 %v71_v25  ;;  %1078 = vmatpush3.msra.mxu0 %v71_v25 }
  0x19   :  { %1144 = vmatpush3.msra.mxu1 %v71_v25  ;;  %1079 = vmatprep.subr.mxu0 %v70_v26 }
  0x1a   :  { %1056 = vmatmul.mubr.msk.f32.gmra.mxu0 %vm24_vm0, %v50_v13  ;;  %1129 = vmatprep.subr.mxu1 %v70_v26 }
  0x1b   :  { %1058 = vmatprep.mubr.msk.f32.mxu0 %vm24_vm0, %v51_v14  ;;  %1080 = vmatpush3.msra.mxu0 %v70_v26 }
  0x1c   :  { %1145 = vmatpush3.msra.mxu1 %v70_v26  ;;  %1081 = vmatprep.subr.mxu0 %v69_v27 }
  0x1d   :  { %1130 = vmatprep.subr.mxu1 %v69_v27  ;;  %1082 = vmatpush3.msra.mxu0 %v69_v27 }
  0x1e   :  { %1059 = vmatmul.mubr.msk.f32.gmra.mxu0 %vm24_vm0, %v52_v15  ;;  %1146 = vmatpush3.msra.mxu1 %v69_v27 }
  0x1f   :  { %1061 = vmatprep.mubr.msk.f32.mxu0 %vm24_vm0, %v53_v16  ;;  %1083 = vmatprep.subr.mxu0 %v68_v28 }
  0x20   :  { %1131 = vmatprep.subr.mxu1 %v68_v28  ;;  %1084 = vmatpush3.msra.mxu0 %v68_v28 }
  0x21   :  { %1147 = vmatpush3.msra.mxu1 %v68_v28  ;;  %1085 = vmatprep.subr.mxu0 %v67_v29 }
  0x22   :  { %1062 = vmatmul.mubr.msk.f32.gmra.mxu0 %vm24_vm0, %v54_v17  ;;  %1132 = vmatprep.subr.mxu1 %v67_v29 }
  0x23   :  { %1064 = vmatprep.mubr.msk.f32.mxu0 %vm24_vm0, %v55_v18  ;;  %1086 = vmatpush3.msra.mxu0 %v67_v29 }
  0x24   :  { %1148 = vmatpush3.msra.mxu1 %v67_v29  ;;  %1087 = vmatprep.subr.mxu0 %v66_v30 }
  0x25   :  { %1133 = vmatprep.subr.mxu1 %v66_v30  ;;  %1088 = vmatpush3.msra.mxu0 %v66_v30 }
  0x26   :  { %1065 = vmatmul.mubr.msk.f32.gmra.mxu0 %vm24_vm0, %v56_v19  ;;  %1149 = vmatpush3.msra.mxu1 %v66_v30 }
  0x27   :  { %1089 = vmatprep.subr.mxu0 %v65_v31  ;;  %1134 = vmatprep.subr.mxu1 %v65_v31 }
  0x28   :  { %1090 = vmatpush3.msra.mxu0 %v65_v31  ;;  %1150 = vmatpush3.msra.mxu1 %v65_v31 }
  0x29   :  { %1091 = vmatprep.subr.mxu0 %v64_v32  ;;  %1135 = vmatprep.subr.mxu1 %v64_v32 }
  0x2a   :  { %1092 = vmatpush3.msra.mxu0 %v64_v32  ;;  %1151 = vmatpush3.msra.mxu1 %v64_v32 }
  0x2b   :  { %1093 = vmatprep.subr.mxu0 %v63_v33  ;;  %1136 = vmatprep.subr.mxu1 %v63_v33 }
  0x2c   :  { %1094 = vmatpush3.msra.mxu0 %v63_v33  ;;  %1152 = vmatpush3.msra.mxu1 %v63_v33 }
  0x2d   :  { %1095 = vmatprep.subr.mxu0 %v62_v34  ;;  %1137 = vmatprep.subr.mxu1 %v62_v34 }
  0x2e   :  { %1096 = vmatpush3.msra.mxu0 %v62_v34  ;;  %1153 = vmatpush3.msra.mxu1 %v62_v34 }
  0x2f   :  { %1097 = vmatprep.subr.mxu0 %v61_v35  ;;  %1138 = vmatprep.subr.mxu1 %v61_v35 }
  0x30   :  { %1098 = vmatpush3.msra.mxu0 %v61_v35  ;;  %1154 = vmatpush3.msra.mxu1 %v61_v35 }
  0xca   :  { %v1045_v38 = vpop.f32.mrf.mxu0 }
  0xcb   :  { %v205_v39 = vadd.f32 %v1045_v38, %v1396_v37 }
  0xcc   :  { %v199_v40 = vpop.f32.mrf.mxu0 }
  0xcd   :  { %v279_v41 = vmul.f32 0.70710677, %v205_v39  ;;  %v200_v42 = vadd.f32 %v1396_v37, %v199_v40  ;;  %v1403_v1 = vmul.f32 0.5, %v205_v39 }
  0xce   :  { %v1048_v43 = vpop.f32.mrf.mxu0 }
  0xcf   :  { %v327_v44 = vand.u32 2147483647, %v279_v41  ;;  %v278_v45 = vmul.f32 0.70710677, %v200_v42  ;;  %v215_v46 = vadd.f32 %v1048_v43, %v1396_v37  ;;  %vm295_vm1 = vcmp.ge.f32.partialorder %v279_v41, 0.0 }
  0xd0   :  { %v209_v47 = vpop.f32.mrf.mxu0  ;;  %v1407_v6 = vsel %vm295_vm1, 1.0, %v1856_v5  ;;  %v1409_v7 = vmul.f32 0.5, %v200_v42 }
  0xd1   :  { %v343_v48 = vmul.f32 0.3275911, %v327_v44  ;;  %v326_v49 = vand.u32 2147483647, %v278_v45  ;;  %v281_v50 = vmul.f32 0.70710677, %v215_v46  ;;  %v210_v51 = vadd.f32 %v1396_v37, %v209_v47 }
  0xd2   :  { %v1051_v52 = vpop.f32.mrf.mxu0  ;;  %v551_v54 = vsub.f32 0.0, %v327_v44  ;;  %vm294_vm2 = vcmp.ge.f32.partialorder %v278_v45, 0.0  ;;  %v1419_v20 = vmul.f32 0.5, %v215_v46 }
  0xd3   :  { %v359_v53 = vadd.f32 1.0, %v343_v48  ;;  %v280_v55 = vmul.f32 0.70710677, %v210_v51  ;;  %v550_v57 = vsub.f32 0.0, %v326_v49  ;;  %v329_v58 = vand.u32 2147483647, %v281_v50 }
  0xd4   :  { %v219_v56 = vpop.f32.mrf.mxu0  ;;  %v567_v60 = vmul.f32 %v551_v54, %v327_v44  ;;  %v342_v61 = vmul.f32 0.3275911, %v326_v49  ;;  %v225_v63 = vadd.f32 %v1051_v52, %v1396_v37  ;;  %v1417_v17 = vsel %vm294_vm2, 1.0, %v1856_v5 }
  0xd5   :  { %1157 = vrcp.f32 %v359_v53  ;;  %v328_v62 = vand.u32 2147483647, %v280_v55  ;;  %v566_v2 = vmul.f32 %v550_v57, %v326_v49  ;;  %v553_v3 = vsub.f32 0.0, %v329_v58 }
  0xd6   :  { %v1054_v59 = vpop.f32.mrf.mxu0  ;;  %v220_v4 = vadd.f32 %v1396_v37, %v219_v56  ;;  %v283_v8 = vmul.f32 0.70710677, %v225_v63  ;;  %v584_v9 = vmul.f32 1.442695, %v567_v60  ;;  %v345_v10 = vmul.f32 0.3275911, %v329_v58 }
  0xd7   :  { %v358_v12 = vadd.f32 1.0, %v342_v61  ;;  %v552_v13 = vsub.f32 0.0, %v328_v62  ;;  %v1414_v15 = vadd.f32 %v1054_v59, %v1396_v37  ;;  %v582_v18 = vmul.f32 1.442695, %v566_v2 }
  0xd8   :  { %v229_v0 = vpop.f32.mrf.mxu0  ;;  %v1411_v11 = vmul.f32 0.70710677, %v220_v4  ;;  %v331_v14 = vand.u32 2147483647, %v283_v8  ;;  %v569_v19 = vmul.f32 %v553_v3, %v329_v58  ;;  %vm297_vm3 = vcmp.ge.f32.partialorder %v281_v50, 0.0 }
  0xd9   :  { %vm296_vm4 = vcmp.ge.f32.partialorder %v280_v55, 0.0  ;;  %v344_v21 = vmul.f32 0.3275911, %v328_v62  ;;  %1159 = vpow2.f32 %v584_v9  ;;  %v361_v23 = vadd.f32 1.0, %v345_v10 }
  0xda   :  { %v1057_v16 = vpop.f32.mrf.mxu0  ;;  %v330_v22 = vand.u32 2147483647, %v1411_v11  ;;  %v1422_v24 = vmul.f32 0.5, %v210_v51  ;;  %v1425_v25 = vmul.f32 0.70710677, %v1414_v15  ;;  %1161 = vrcp.f32 %v358_v12 }
  0xdb   :  { %v568_v26 = vmul.f32 %v552_v13, %v328_v62  ;;  %v555_v27 = vsub.f32 0.0, %v331_v14  ;;  %v1428_v28 = vadd.f32 %v1396_v37, %v229_v0  ;;  %1163 = vpow2.f32 %v582_v18 }
  0xdc   :  { %v239_v29 = vpop.f32.mrf.mxu0  ;;  %v1431_v30 = vsel %vm297_vm3, 1.0, %v1856_v5  ;;  %v588_v31 = vmul.f32 1.442695, %v569_v19  ;;  %v1434_v32 = vsel %vm296_vm4, 1.0, %v1856_v5  ;;  %v360_v34 = vadd.f32 1.0, %v344_v21 }
  0xdd   :  { %v347_v35 = vmul.f32 0.3275911, %v331_v14  ;;  %v554_v36 = vsub.f32 0.0, %v330_v22  ;;  %v1439_v38 = vadd.f32 %v1057_v16, %v1396_v37  ;;  %1165 = vrcp.f32 %v361_v23 }
  0xde   :  { %v1442_v40 = vmul.f32 0.5, %v225_v63  ;;  %v333_v41 = vand.u32 2147483647, %v1425_v25  ;;  %v586_v42 = vmul.f32 1.442695, %v568_v26  ;;  %vm299_vm5 = vcmp.ge.f32.partialorder %v283_v8, 0.0  ;;  %v1060_v45 = vpop.f32.mrf.mxu0 }
  0xdf   :  { %v571_v43 = vmul.f32 %v555_v27, %v331_v14  ;;  %v1446_v44 = vmul.f32 0.70710677, %v1428_v28  ;;  %1167 = vpow2.f32 %v588_v31  ;;  %v346_v47 = vmul.f32 0.3275911, %v330_v22 }
  0xe0   :  { %v1448_v48 = vmul.f32 0.5, %v220_v4  ;;  %1169 = vrcp.f32 %v360_v34  ;;  %v363_v49 = vadd.f32 1.0, %v347_v35  ;;  %v570_v50 = vmul.f32 %v554_v36, %v330_v22  ;;  %v249_v58 = vpop.f32.mrf.mxu0 }
  0xe1   :  { %v287_v51 = vmul.f32 0.70710677, %v1439_v38  ;;  %v1453_v53 = vsel %vm299_vm5, 1.0, %v1856_v5  ;;  %vm298_vm6 = vcmp.ge.f32.partialorder %v1411_v11, 0.0  ;;  %v557_v54 = vsub.f32 0.0, %v333_v41 }
  0xe2   :  { %v1436_v33 = vpop.eup %1157  ;;  %1171 = vpow2.f32 %v586_v42  ;;  %v592_v55 = vmul.f32 1.442695, %v571_v43  ;;  %v349_v56 = vmul.f32 0.3275911, %v333_v41  ;;  %v332_v57 = vand.u32 2147483647, %v1446_v44  ;;  %v1063_v14 = vpop.f32.mrf.mxu0 }
  0xe3   :  { %v407_v39 = vmul.f32 1.0614054, %v1436_v33  ;;  %v362_v60 = vadd.f32 1.0, %v346_v47  ;;  %v1458_v61 = vadd.f32 %v1396_v37, %v239_v29  ;;  %v1461_v62 = vadd.f32 %v1060_v45, %v1396_v37 }
  0xe4   :  { %1173 = vrcp.f32 %v363_v49  ;;  %v590_v63 = vmul.f32 1.442695, %v570_v50  ;;  %vm301_vm7 = vcmp.ge.f32.partialorder %v1425_v25, 0.0  ;;  %v335_v0 = vand.u32 2147483647, %v287_v51 }
  0xe5   :  { %v423_v46 = vadd.f32 -1.4531521, %v407_v39  ;;  %1867 = vst [vmem:[#allocation3_spill] sm:$0xff] %v1461_v62  ;;  %v573_v3 = vmul.f32 %v557_v54, %v333_v41  ;;  %v1466_v4 = vmul.f32 0.70710677, %v1458_v61  ;;  %1175 = vpow2.f32 %v592_v55  ;;  %v259_v41 = vpop.f32.mrf.mxu0 }
  0xe6   :  { %v1469_v8 = vmul.f32 0.70710677, %v1461_v62  ;;  %v1160_v9 = vpop.eup %1159  ;;  %v1474_v10 = vsel %vm298_vm6, 1.0, %v1856_v5  ;;  %v365_v12 = vadd.f32 1.0, %v349_v56  ;;  %v556_v13 = vsub.f32 0.0, %v332_v57 }
  0xe7   :  { %v439_v52 = vmul.f32 %v1436_v33, %v423_v46  ;;  %v1476_v16 = vpop.eup %1161  ;;  %1177 = vrcp.f32 %v362_v60  ;;  %v348_v19 = vmul.f32 0.3275911, %v332_v57  ;;  %v334_v21 = vand.u32 2147483647, %v1466_v4 }
  0xe8   :  { %v1479_v22 = vpop.eup %1163  ;;  %1179 = vpow2.f32 %v590_v63  ;;  %v1484_v23 = vsel %vm301_vm7, 1.0, %v1856_v5  ;;  %v1487_v11 = vmul.f32 0.5, %v1414_v15  ;;  %v559_v26 = vsub.f32 0.0, %v335_v0 }
  0xe9   :  { %v455_v59 = vadd.f32 1.4214138, %v439_v52  ;;  %v596_v29 = vmul.f32 1.442695, %v573_v3  ;;  %vm303_vm8 = vcmp.ge.f32.partialorder %v287_v51, 0.0  ;;  %v572_v35 = vmul.f32 %v556_v13, %v332_v57  ;;  %v1066_v3 = vpop.f32.mrf.mxu0 }
  0xea   :  { %v337_v31 = vand.u32 2147483647, %v1469_v8  ;;  %v1491_v34 = vpop.eup %1165  ;;  %v558_v36 = vsub.f32 0.0, %v334_v21  ;;  %v1494_v39 = vadd.f32 %v1396_v37, %v249_v58  ;;  %v1497_v25 = vadd.f32 %v1063_v14, %v1396_v37 }
  0xeb   :  { %v471_v2 = vmul.f32 %v1436_v33, %v455_v59  ;;  %1181 = vrcp.f32 %v365_v12  ;;  %v364_v42 = vadd.f32 1.0, %v348_v19  ;;  %v351_v43 = vmul.f32 0.3275911, %v335_v0 }
  0xec   :  { %1868 = vst [vmem:[#allocation4_spill] sm:$0xff] %v1497_v25  ;;  %v1499_v45 = vpop.eup %1167  ;;  %v1502_v46 = vsel %vm303_vm8, 1.0, %v1856_v5  ;;  %v575_v47 = vmul.f32 %v559_v26, %v335_v0  ;;  %v561_v49 = vsub.f32 0.0, %v337_v31  ;;  %v1505_v50 = vmul.f32 0.70710677, %v1494_v39 }
  0xed   :  { %v487_v18 = vadd.f32 -0.28449672, %v471_v2  ;;  %1869 = vst [vmem:[#allocation5_spill] sm:$0xff] %v1502_v46  ;;  %v1507_v51 = vpop.eup %1169  ;;  %v350_v54 = vmul.f32 0.3275911, %v334_v21  ;;  %v1514_v56 = vadd.f32 %v1396_v37, %v259_v41  ;;  %1183 = vpow2.f32 %v596_v29  ;;  %v269_v41 = vpop.f32.mrf.mxu0 }
  0xee   :  { %v1511_v55 = vmul.f32 0.70710677, %v1497_v25  ;;  %v594_v57 = vmul.f32 1.442695, %v572_v35  ;;  %v574_v58 = vmul.f32 %v558_v36, %v334_v21  ;;  %v336_v59 = vand.u32 2147483647, %v1505_v50 }
  0xef   :  { %v503_v27 = vmul.f32 %v1436_v33, %v487_v18  ;;  %1870 = vst [vmem:[#allocation6_spill] sm:$0xff] %v1514_v56  ;;  %v1517_v60 = vpop.eup %1171  ;;  %1185 = vrcp.f32 %v364_v42  ;;  %v367_v0 = vadd.f32 1.0, %v351_v43  ;;  %v353_v2 = vmul.f32 0.3275911, %v337_v31 }
  0xf0   :  { %v577_v12 = vmul.f32 %v561_v49, %v337_v31  ;;  %v352_v13 = vmul.f32 0.3275911, %v336_v59  ;;  %v560_v14 = vsub.f32 0.0, %v336_v59  ;;  %v366_v26 = vadd.f32 1.0, %v350_v54 }
  0xf1   :  { %v519_v15 = vadd.f32 0.2548296, %v503_v27  ;;  %v1519_v18 = vpop.eup %1173  ;;  %v339_v27 = vand.u32 2147483647, %v1511_v55  ;;  %v1523_v21 = vmul.f32 0.70710677, %v1514_v56  ;;  %1187 = vpow2.f32 %v594_v57 }
  0xf2   :  { %v598_v29 = vmul.f32 1.442695, %v574_v58  ;;  %v576_v35 = vmul.f32 %v560_v14, %v336_v59  ;;  %v1528_v36 = vpop.eup %1175  ;;  %1189 = vrcp.f32 %v367_v0  ;;  %vm302_vm9 = vcmp.ge.f32.partialorder %v1466_v4, 0.0 }
  0xf3   :  { %v535_v52 = vmul.f32 %v1436_v33, %v519_v15  ;;  %v600_v33 = vmul.f32 1.442695, %v575_v47  ;;  %1871 = vst [vmem:[#allocation7_spill] sm:$0xff] %v1523_v21  ;;  %vm305_vm10 = vcmp.ge.f32.partialorder %v1469_v8, 0.0  ;;  %v369_v31 = vadd.f32 1.0, %v353_v2 }
  0xf4   :  { %v1532_v15 = vpop.eup %1177  ;;  %v604_v43 = vmul.f32 1.442695, %v577_v12  ;;  %v368_v49 = vadd.f32 1.0, %v352_v13  ;;  %v1539_v54 = vadd.f32 %v1066_v3, %v1396_v37  ;;  %v602_v57 = vmul.f32 1.442695, %v576_v35 }
  0xf5   :  { %v615_v63 = vmul.f32 %v1160_v9, %v535_v52  ;;  %v1526_v9 = vmul.f32 0.5, %v1439_v38  ;;  %1191 = vpow2.f32 %v600_v33  ;;  %v338_v38 = vand.u32 2147483647, %v1523_v21  ;;  %v1536_v47 = vpop.eup %1179 }
  0xf6   :  { %1193 = vrcp.f32 %v366_v26  ;;  %v563_v52 = vsub.f32 0.0, %v339_v27  ;;  %1873 = vst [vmem:[#allocation9_spill] sm:$0xff] %v1539_v54  ;;  %v355_v58 = vmul.f32 0.3275911, %v339_v27  ;;  %v1542_v59 = vadd.f32 %v1396_v37, %v269_v41 }
  0xf7   :  { %v631_v19 = vsub.f32 1.0, %v615_v63  ;;  %1872 = vst [vmem:[#allocation8_spill] sm:$0xff] %v1526_v9  ;;  %1195 = vpow2.f32 %v598_v29  ;;  %v562_v63 = vsub.f32 0.0, %v338_v38  ;;  %v1548_v0 = vmul.f32 0.70710677, %v1539_v54 }
  0xf8   :  { %1874 = vst [vmem:[#allocation10_spill] sm:$0xff] %v1542_v59  ;;  %1197 = vrcp.f32 %v369_v31  ;;  %v1550_v2 = vpop.eup %1181  ;;  %v1555_v3 = vsel %vm302_vm9, 1.0, %v1856_v5  ;;  %v1558_v37 = vmul.f32 0.70710677, %v1542_v59  ;;  %v579_v12 = vmul.f32 %v563_v52, %v339_v27 }
  0xf9   :  { %v647_v42 = vmul.f32 %v631_v19, %v1407_v6  ;;  %v1545_v6 = vmul.f32 0.5, %v1458_v61  ;;  %1875 = vst [vmem:[#allocation11_spill] sm:$0xff] %v1548_v0  ;;  %1199 = vpow2.f32 %v604_v43  ;;  %v1563_v61 = vsel %vm305_vm10, 1.0, %v1856_v5 }
  0xfa   :  { %1876 = vst [vmem:[#allocation12_spill] sm:$0xff] %v1558_v37  ;;  %1877 = vst [vmem:[#allocation13_spill] sm:$0xff] %v1563_v61  ;;  %1201 = vrcp.f32 %v368_v49  ;;  %v341_v13 = vand.u32 2147483647, %v1548_v0  ;;  %v1567_v14 = vmul.f32 0.5, %v1494_v39  ;;  %v371_v4 = vadd.f32 1.0, %v355_v58  ;;  %v1569_v26 = vpop.eup %1183 }
  0xfb   :  { %v679_v33 = vadd.f32 1.0, %v647_v42  ;;  %1203 = vpow2.f32 %v602_v57  ;;  %v354_v19 = vmul.f32 0.3275911, %v338_v38  ;;  %v578_v29 = vmul.f32 %v562_v63, %v338_v38 }
  0xfc   :  { %1878 = vst [vmem:[#allocation14_spill] sm:$0xff] %v1567_v14  ;;  %v357_v35 = vmul.f32 0.3275911, %v341_v13  ;;  %v565_v31 = vsub.f32 0.0, %v341_v13  ;;  %v340_v41 = vand.u32 2147483647, %v1558_v37  ;;  %v1572_v8 = vpop.eup %1185  ;;  %1205 = vrcp.f32 %v371_v4 }
  0xfd   :  { %v1575_v42 = vmul.f32 %v679_v33, %v1403_v1  ;;  %v406_v27 = vmul.f32 1.0614054, %v1476_v16  ;;  %v408_v43 = vmul.f32 1.0614054, %v1507_v51  ;;  %v409_v39 = vmul.f32 1.0614054, %v1491_v34 }
  0xfe   :  { %v608_v49 = vmul.f32 1.442695, %v579_v12  ;;  %v581_v52 = vmul.f32 %v565_v31, %v341_v13  ;;  %v356_v57 = vmul.f32 0.3275911, %v340_v41  ;;  %v564_v58 = vsub.f32 0.0, %v340_v41  ;;  %v1580_v54 = vpop.eup %1187 }
  0xff   :  { %v422_v38 = vadd.f32 -1.4531521, %v406_v27  ;;  %v424_v63 = vadd.f32 -1.4531521, %v408_v43  ;;  %v425_v5 = vadd.f32 -1.4531521, %v409_v39  ;;  %v1582_v0 = vpop.eup %1189 }
 0x100   :  { %v370_v59 = vadd.f32 1.0, %v354_v19  ;;  %v606_v25 = vmul.f32 1.442695, %v578_v29  ;;  %v373_v1 = vadd.f32 1.0, %v357_v35  ;;  %v580_v33 = vmul.f32 %v564_v58, %v340_v41 }
 0x101   :  { %v438_v56 = vmul.f32 %v1476_v16, %v422_v38  ;;  %v440_v37 = vmul.f32 %v1507_v51, %v424_v63  ;;  %v441_v12 = vmul.f32 %v1491_v34, %v425_v5  ;;  %v410_v13 = vmul.f32 1.0614054, %v1532_v15 }
 0x102   :  { %v1588_v4 = vpop.eup %1191  ;;  %v1590_v31 = vmul.f32 1.442695, %v581_v52  ;;  %v372_v27 = vadd.f32 1.0, %v356_v57  ;;  %v411_v19 = vmul.f32 1.0614054, %v1519_v18  ;;  %vm300_vm11 = vcmp.ge.f32.partialorder %v1446_v44, 0.0 }
 0x103   :  { %v1594_v29 = vpop.eup %1193  ;;  %1207 = vpow2.f32 %v608_v49  ;;  %v454_v35 = vadd.f32 1.4214138, %v438_v56  ;;  %v456_v41 = vadd.f32 1.4214138, %v440_v37  ;;  %v457_v43 = vadd.f32 1.4214138, %v441_v12 }
 0x104   :  { %v1596_v39 = vpop.eup %1195  ;;  %1209 = vrcp.f32 %v370_v59  ;;  %v1598_v5 = vmul.f32 1.442695, %v580_v33  ;;  %v426_v58 = vadd.f32 -1.4531521, %v410_v13  ;;  %v427_v38 = vadd.f32 -1.4531521, %v411_v19 }
 0x105   :  { %v1600_v52 = vpop.eup %1197  ;;  %v470_v57 = vmul.f32 %v1476_v16, %v454_v35  ;;  %v472_v63 = vmul.f32 %v1507_v51, %v456_v41  ;;  %v473_v62 = vmul.f32 %v1491_v34, %v457_v43  ;;  %v412_v49 = vmul.f32 1.0614054, %v1572_v8 }
 0x106   :  { %v1606_v56 = vpop.eup %1199  ;;  %v442_v37 = vmul.f32 %v1532_v15, %v426_v58  ;;  %v443_v59 = vmul.f32 %v1519_v18, %v427_v38  ;;  %v1880_v33 = vmov -1.0   ;;  %v413_v13 = vmul.f32 1.0614054, %v1550_v2 }
 0x107   :  { %1879 = vst [vmem:[#allocation15_spill] sm:$0xff] %v1606_v56  ;;  %v1613_v12 = vsel %vm300_vm11, 1.0, %v1880_v33  ;;  %v1616_v19 = vpop.eup %1201  ;;  %1211 = vpow2.f32 %v606_v25  ;;  %v486_v35 = vadd.f32 -0.28449672, %v470_v57  ;;  %v488_v41 = vadd.f32 -0.28449672, %v472_v63 }
 0x108   :  { %v489_v43 = vadd.f32 -0.28449672, %v473_v62  ;;  %v1618_v14 = vpop.eup %1203  ;;  %1213 = vrcp.f32 %v373_v1  ;;  %v458_v9 = vadd.f32 1.4214138, %v442_v37  ;;  %v459_v58 = vadd.f32 1.4214138, %v443_v59 }
 0x109   :  { %v428_v61 = vadd.f32 -1.4531521, %v412_v49  ;;  %v502_v38 = vmul.f32 %v1476_v16, %v486_v35  ;;  %v504_v44 = vmul.f32 %v1507_v51, %v488_v41  ;;  %v429_v21 = vadd.f32 -1.4531521, %v413_v13  ;;  %v1628_v59 = vpop.eup %1205 }
 0x10a   :  { %v505_v46 = vmul.f32 %v1491_v34, %v489_v43  ;;  %v474_v56 = vmul.f32 %v1532_v15, %v458_v9  ;;  %v475_v25 = vmul.f32 %v1519_v18, %v459_v58  ;;  %v414_v62 = vmul.f32 1.0614054, %v1594_v29 }
 0x10b   :  { %v444_v57 = vmul.f32 %v1572_v8, %v428_v61  ;;  %v518_v63 = vadd.f32 0.2548296, %v502_v38  ;;  %v520_v1 = vadd.f32 0.2548296, %v504_v44  ;;  %v445_v49 = vmul.f32 %v1550_v2, %v429_v21 }
 0x10c   :  { %v521_v37 = vadd.f32 0.2548296, %v505_v46  ;;  %1215 = vrcp.f32 %v372_v27  ;;  %v490_v35 = vadd.f32 -0.28449672, %v474_v56  ;;  %v491_v41 = vadd.f32 -0.28449672, %v475_v25 }
 0x10d   :  { %v460_v43 = vadd.f32 1.4214138, %v444_v57  ;;  %v534_v13 = vmul.f32 %v1476_v16, %v518_v63  ;;  %v536_v9 = vmul.f32 %v1507_v51, %v520_v1  ;;  %v461_v61 = vadd.f32 1.4214138, %v445_v49 }
 0x10e   :  { %v537_v58 = vmul.f32 %v1491_v34, %v521_v37  ;;  %v506_v33 = vmul.f32 %v1532_v15, %v490_v35  ;;  %v507_v38 = vmul.f32 %v1519_v18, %v491_v41  ;;  %v430_v21 = vadd.f32 -1.4531521, %v414_v62 }
 0x10f   :  { %v476_v46 = vmul.f32 %v1572_v8, %v460_v43  ;;  %v614_v44 = vmul.f32 %v1479_v22, %v534_v13  ;;  %v616_v27 = vmul.f32 %v1517_v60, %v536_v9  ;;  %v477_v16 = vmul.f32 %v1550_v2, %v461_v61 }
 0x110   :  { %v617_v56 = vmul.f32 %v1499_v45, %v537_v58  ;;  %v1640_v25 = vpop.eup %1207  ;;  %v522_v51 = vadd.f32 0.2548296, %v506_v33  ;;  %v523_v34 = vadd.f32 0.2548296, %v507_v38  ;;  %v446_v63 = vmul.f32 %v1594_v29, %v430_v21 }
 0x111   :  { %v492_v57 = vadd.f32 -0.28449672, %v476_v46  ;;  %v1643_v1 = vpop.eup %1209  ;;  %v630_v37 = vsub.f32 1.0, %v614_v44  ;;  %v632_v49 = vsub.f32 1.0, %v616_v27  ;;  %v493_v35 = vadd.f32 -0.28449672, %v477_v16 }
 0x112   :  { %v633_v62 = vsub.f32 1.0, %v617_v56  ;;  %v538_v22 = vmul.f32 %v1532_v15, %v522_v51  ;;  %v539_v60 = vmul.f32 %v1519_v18, %v523_v34  ;;  %v462_v41 = vadd.f32 1.4214138, %v446_v63 }
 0x113   :  { %v508_v45 = vmul.f32 %v1572_v8, %v492_v57  ;;  %v646_v43 = vmul.f32 %v630_v37, %v1417_v17  ;;  %v648_v33 = vmul.f32 %v632_v49, %v1434_v32  ;;  %v509_v9 = vmul.f32 %v1550_v2, %v493_v35 }
 0x114   :  { %v649_v13 = vmul.f32 %v633_v62, %v1431_v30  ;;  %v1652_v58 = vpop.eup %1211  ;;  %v618_v61 = vmul.f32 %v1536_v47, %v538_v22  ;;  %v619_v38 = vmul.f32 %v1528_v36, %v539_v60  ;;  %v478_v18 = vmul.f32 %v1594_v29, %v462_v41 }
 0x115   :  { %v524_v15 = vadd.f32 0.2548296, %v508_v45  ;;  %v1657_v46 = vpop.eup %1213  ;;  %v678_v21 = vadd.f32 1.0, %v646_v43  ;;  %v680_v44 = vadd.f32 1.0, %v648_v33  ;;  %v668_v17 = vmul.f32 0.5, %v1428_v28 }
 0x116   :  { %v525_v32 = vadd.f32 0.2548296, %v509_v9  ;;  %v634_v27 = vsub.f32 1.0, %v618_v61  ;;  %v635_v30 = vsub.f32 1.0, %v619_v38  ;;  %v494_v16 = vadd.f32 -0.28449672, %v478_v18 }
 0x117   :  { %v540_v56 = vmul.f32 %v1572_v8, %v524_v15  ;;  %v694_v51 = vmul.f32 %v678_v21, %v1409_v7  ;;  %v696_v47 = vmul.f32 %v680_v44, %v1422_v24  ;;  %v681_v36 = vadd.f32 1.0, %v649_v13 }
 0x118   :  { %v541_v34 = vmul.f32 %v1550_v2, %v525_v32  ;;  %v650_v57 = vmul.f32 %v634_v27, %v1474_v10  ;;  %v651_v63 = vmul.f32 %v635_v30, %v1453_v53  ;;  %v510_v28 = vmul.f32 %v1594_v29, %v494_v16 }
 0x119   :  { %v620_v37 = vmul.f32 %v1580_v54, %v540_v56  ;;  %v1668_v49 = vpop.eup %1215  ;;  %1099 = vmatprep.mubr.f32.mxu0 %v694_v51  ;;  %v415_v7 = vmul.f32 1.0614054, %v1582_v0  ;;  %v416_v24 = vmul.f32 1.0614054, %v1616_v19  ;;  %v417_v62 = vmul.f32 1.0614054, %v1600_v52 }
 0x11a   :  { %v621_v8 = vmul.f32 %v1569_v26, %v541_v34  ;;  %1100 = vmatmul.mubr.f32.vlgmr.msra.gmra.mxu0 %v1575_v42  ;;  %v682_v10 = vadd.f32 1.0, %v650_v57  ;;  %v683_v2 = vadd.f32 1.0, %v651_v63  ;;  %v526_v35 = vadd.f32 0.2548296, %v510_v28 }
 0x11b   :  { %v636_v53 = vsub.f32 1.0, %v620_v37  ;;  %1102 = vmatprep.mubr.f32.mxu0 %v696_v47  ;;  %v697_v54 = vmul.f32 %v681_v36, %v1419_v20  ;;  %v431_v60 = vadd.f32 -1.4531521, %v415_v7  ;;  %v432_v45 = vadd.f32 -1.4531521, %v416_v24 }
 0x11c   :  { %v637_v22 = vsub.f32 1.0, %v621_v8  ;;  %v698_v26 = vmul.f32 %v682_v10, %v1448_v48  ;;  %v699_v41 = vmul.f32 %v683_v2, %v1442_v40  ;;  %v542_v33 = vmul.f32 %v1594_v29, %v526_v35 }
 0x11d   :  { %v652_v43 = vmul.f32 %v636_v53, %v1613_v12  ;;  %v447_v13 = vmul.f32 %v1582_v0, %v431_v60  ;;  %v448_v9 = vmul.f32 %v1616_v19, %v432_v45  ;;  %v433_v61 = vadd.f32 -1.4531521, %v417_v62 }
 0x11e   :  { %v653_v42 = vmul.f32 %v637_v22, %v1484_v23  ;;  %1103 = vmatmul.mubr.f32.gmra.mxu0 %v697_v54  ;;  %v622_v38 = vmul.f32 %v1596_v39, %v542_v33  ;;  %v418_v15 = vmul.f32 1.0614054, %v1643_v1  ;;  %v419_v48 = vmul.f32 1.0614054, %v1628_v59 }
 0x11f   :  { %v684_v20 = vadd.f32 1.0, %v652_v43  ;;  %1105 = vmatprep.mubr.f32.mxu0 %v698_v26  ;;  %v463_v12 = vadd.f32 1.4214138, %v447_v13  ;;  %v464_v18 = vadd.f32 1.4214138, %v448_v9  ;;  %v449_v29 = vmul.f32 %v1600_v52, %v433_v61 }
 0x120   :  { %v685_v40 = vadd.f32 1.0, %v653_v42  ;;  %v638_v21 = vsub.f32 1.0, %v622_v38  ;;  %v434_v44 = vadd.f32 -1.4531521, %v418_v15  ;;  %v435_v32 = vadd.f32 -1.4531521, %v419_v48 }
 0x121   :  { %v700_v23 = vmul.f32 %v684_v20, %v668_v17  ;;  %vm304_vm12 = vcmp.ge.f32.partialorder %v1505_v50, 0.0  ;;  %v479_v39 = vmul.f32 %v1582_v0, %v463_v12  ;;  %v480_v30 = vmul.f32 %v1616_v19, %v464_v18 }
 0x122   :  { %v701_v27 = vmul.f32 %v685_v40, %v1487_v11  ;;  %v465_v56 = vadd.f32 1.4214138, %v449_v29  ;;  %1106 = vmatmul.mubr.f32.gmra.mxu0 %v699_v41  ;;  %v654_v16 = vmul.f32 %v638_v21, %v1555_v3  ;;  %v450_v51 = vmul.f32 %v1643_v1, %v434_v44  ;;  %v1882_v29 = vld [vmem:[#allocation15_spill] sm:$0xff] }
 0x123   :  { %1108 = vmatprep.mubr.f32.mxu1 %v700_v23  ;;  %v451_v17 = vmul.f32 %v1628_v59, %v435_v32  ;;  %v420_v47 = vmul.f32 1.0614054, %v1668_v49  ;;  %v495_v36 = vadd.f32 -0.28449672, %v479_v39  ;;  %v496_v34 = vadd.f32 -0.28449672, %v480_v30 }
 0x124   :  { %1109 = vmatmul.mubr.f32.vlgmr.msra.gmra.mxu1 %v701_v27  ;;  %v481_v11 = vmul.f32 %v1600_v52, %v465_v56  ;;  %v421_v57 = vmul.f32 1.0614054, %v1657_v46  ;;  %1217 = vpow2.f32 %v1598_v5  ;;  %v686_v63 = vadd.f32 1.0, %v654_v16  ;;  %v1884_v32 = vld [vmem:[#allocation5_spill] sm:$0xff] }
 0x125   :  { %v466_v37 = vadd.f32 1.4214138, %v450_v51  ;;  %v467_v28 = vadd.f32 1.4214138, %v451_v17  ;;  %v511_v3 = vmul.f32 %v1582_v0, %v495_v36  ;;  %v512_v8 = vmul.f32 %v1616_v19, %v496_v34  ;;  %v1885_v36 = vld [vmem:[#allocation13_spill] sm:$0xff] }
 0x126   :  { %v497_v7 = vadd.f32 -0.28449672, %v481_v11  ;;  %v436_v24 = vadd.f32 -1.4531521, %v420_v47  ;;  %v702_v62 = vmul.f32 %v686_v63, %v1545_v6  ;;  %v437_v53 = vadd.f32 -1.4531521, %v421_v57 }
 0x127   :  { %v482_v10 = vmul.f32 %v1643_v1, %v466_v37  ;;  %v483_v2 = vmul.f32 %v1628_v59, %v467_v28  ;;  %v527_v35 = vadd.f32 0.2548296, %v511_v3  ;;  %v528_v54 = vadd.f32 0.2548296, %v512_v8  ;;  %v1886_v28 = vld [vmem:[#allocation8_spill] sm:$0xff] }
 0x128   :  { %v513_v5 = vmul.f32 %v1600_v52, %v497_v7  ;;  %v452_v22 = vmul.f32 %v1668_v49, %v436_v24  ;;  %1219 = vpow2.f32 %v1590_v31  ;;  %1111 = vmatprep.mubr.f32.mxu1 %v702_v62  ;;  %v453_v26 = vmul.f32 %v1657_v46, %v437_v53  ;;  %v1888_v53 = vld [vmem:[#allocation3_spill] sm:$0xff] }
 0x129   :  { %v498_v60 = vadd.f32 -0.28449672, %v482_v10  ;;  %v499_v45 = vadd.f32 -0.28449672, %v483_v2  ;;  %v543_v6 = vmul.f32 %v1582_v0, %v527_v35  ;;  %v544_v41 = vmul.f32 %v1616_v19, %v528_v54  ;;  %v1889_v54 = vld [vmem:[#allocation12_spill] sm:$0xff] }
 0x12a   :  { %v529_v43 = vadd.f32 0.2548296, %v513_v5  ;;  %v468_v33 = vadd.f32 1.4214138, %v452_v22  ;;  %vm307_vm13 = vcmp.ge.f32.partialorder %v1511_v55, 0.0  ;;  %v1881_v0 = vmov -1.0  }
 0x12b   :  { %v514_v42 = vmul.f32 %v1643_v1, %v498_v60  ;;  %v515_v13 = vmul.f32 %v1628_v59, %v499_v45  ;;  %v469_v9 = vadd.f32 1.4214138, %v453_v26  ;;  %v623_v31 = vmul.f32 %v1588_v4, %v543_v6  ;;  %v1883_v4 = vld [vmem:[#allocation7_spill] sm:$0xff]  ;;  %v1890_v22 = vld [vmem:[#allocation6_spill] sm:$0xff] }
 0x12c   :  { %v624_v61 = vmul.f32 %v1618_v14, %v544_v41  ;;  %v545_v20 = vmul.f32 %v1600_v52, %v529_v43  ;;  %v484_v38 = vmul.f32 %v1668_v49, %v468_v33  ;;  %v320_v19 = vsel %vm304_vm12, 1.0, %v1881_v0  ;;  %v1891_v45 = vld [vmem:[#allocation11_spill] sm:$0xff] }
 0x12d   :  { %v530_v15 = vadd.f32 0.2548296, %v514_v42  ;;  %v531_v48 = vadd.f32 0.2548296, %v515_v13  ;;  %v485_v40 = vmul.f32 %v1657_v46, %v469_v9  ;;  %v639_v12 = vsub.f32 1.0, %v623_v31  ;;  %v1892_v13 = vld [vmem:[#allocation4_spill] sm:$0xff] }
 0x12e   :  { %v640_v18 = vsub.f32 1.0, %v624_v61  ;;  %v625_v23 = vmul.f32 %v1882_v29, %v545_v20  ;;  %v500_v21 = vadd.f32 -0.28449672, %v484_v38  ;;  %vm306_vm14 = vcmp.ge.f32.partialorder %v1883_v4, 0.0  ;;  %v1893_v38 = vld [vmem:[#allocation10_spill] sm:$0xff] }
 0x12f   :  { %v546_v14 = vmul.f32 %v1643_v1, %v530_v15  ;;  %v547_v52 = vmul.f32 %v1628_v59, %v531_v48  ;;  %v501_v44 = vadd.f32 -0.28449672, %v485_v40  ;;  %v655_v27 = vmul.f32 %v639_v12, %v1884_v32  ;;  %v1894_v12 = vld [vmem:[#allocation9_spill] sm:$0xff] }
 0x130   :  { %v656_v50 = vmul.f32 %v640_v18, %v320_v19  ;;  %v641_v39 = vsub.f32 1.0, %v625_v23  ;;  %v516_v30 = vmul.f32 %v1668_v49, %v500_v21  ;;  %v323_v56 = vsel %vm307_vm13, 1.0, %v1881_v0  ;;  %v711_v21 = vld [vmem:[#allocation2 + $0x8] sm:$0xff] }
 0x131   :  { %v626_v16 = vmul.f32 %v1652_v58, %v546_v14  ;;  %v627_v51 = vmul.f32 %v1640_v25, %v547_v52  ;;  %v517_v17 = vmul.f32 %v1657_v46, %v501_v44  ;;  %v1218_v1 = vpop.eup %1217  ;;  %v687_v47 = vadd.f32 1.0, %v655_v27  ;;  %v1887_v58 = vld [vmem:[#allocation14_spill] sm:$0xff]  ;;  %v710_v14 = vld [vmem:[#allocation2] sm:$0xff] }
 0x132   :  { %v688_v59 = vadd.f32 1.0, %v656_v50  ;;  %v657_v34 = vmul.f32 %v641_v39, %v1885_v36  ;;  %v532_v11 = vadd.f32 0.2548296, %v516_v30  ;;  %v322_v57 = vsel %vm306_vm14, 1.0, %v1881_v0  ;;  %v713_v44 = vld [vmem:[#allocation2 + $0x18] sm:$0xff]  ;;  %v712_v50 = vld [vmem:[#allocation2 + $0x10] sm:$0xff] }
 0x133   :  { %v642_v63 = vsub.f32 1.0, %v626_v16  ;;  %v643_v37 = vsub.f32 1.0, %v627_v51  ;;  %v533_v55 = vadd.f32 0.2548296, %v517_v17  ;;  %v703_v3 = vmul.f32 %v687_v47, %v1886_v28  ;;  %v717_v51 = vld [vmem:[#allocation2 + $0x38] sm:$0xff]  ;;  %v714_v47 = vld [vmem:[#allocation2 + $0x20] sm:$0xff] }
 0x134   :  { %v704_v8 = vmul.f32 %v688_v59, %v1887_v58  ;;  %v689_v25 = vadd.f32 1.0, %v657_v34  ;;  %v548_v7 = vmul.f32 %v1668_v49, %v532_v11  ;;  %v673_v35 = vmul.f32 0.5, %v1888_v53  ;;  %v1755_v17 = vld [vmem:[%s1854_s4] ss:$0 sm:$0xff]  ;;  %v716_v34 = vld [vmem:[#allocation2 + $0x30] sm:$0xff] }
 0x135   :  { %v658_v24 = vmul.f32 %v642_v63, %v322_v57  ;;  %v659_v62 = vmul.f32 %v643_v37, %v323_v56  ;;  %v549_v10 = vmul.f32 %v1657_v46, %v533_v55  ;;  %v1220_v2 = vpop.eup %1219  ;;  %vm308_vm15 = vcmp.ge.f32.partialorder %v1889_v54, 0.0  ;;  %1112 = vmatmul.mubr.f32.gmra.mxu1 %v703_v3  ;;  %v715_v56 = vld [vmem:[#allocation2 + $0x28] sm:$0xff] }
 0x136   :  { %v628_v5 = vmul.f32 %v1218_v1, %v548_v7  ;;  %v674_v60 = vmul.f32 0.5, %v1890_v22  ;;  %vm309_vm1 = vcmp.ge.f32.partialorder %v1891_v45, 0.0  ;;  %1114 = vmatprep.mubr.f32.mxu1 %v704_v8  ;;  %v705_v41 = vmul.f32 %v689_v25, %v673_v35  ;;  %v719_v45 = vld [vmem:[#allocation2 + $0x48] sm:$0xff] }
 0x137   :  { %v690_v26 = vadd.f32 1.0, %v658_v24  ;;  %v629_v6 = vmul.f32 %v1220_v2, %v549_v10  ;;  %v691_v49 = vadd.f32 1.0, %v659_v62  ;;  %v324_v33 = vsel %vm308_vm15, 1.0, %v1881_v0 }
 0x138   :  { %v644_v43 = vsub.f32 1.0, %v628_v5  ;;  %v675_v9 = vmul.f32 0.5, %v1892_v13  ;;  %v325_v31 = vsel %vm309_vm1, 1.0, %v1881_v0  ;;  %v676_v19 = vmul.f32 0.5, %v1893_v38  ;;  %v722_v38 = vld [vmem:[#allocation2 + $0x60] sm:$0xff] }
 0x139   :  { %v706_v46 = vmul.f32 %v690_v26, %v674_v60  ;;  %v645_v42 = vsub.f32 1.0, %v629_v6  ;;  %1115 = vmatmul.mubr.f32.gmra.mxu1 %v705_v41  ;;  %v677_v18 = vmul.f32 0.5, %v1894_v12  ;;  %v718_v6 = vld [vmem:[#allocation2 + $0x40] sm:$0xff] }
 0x13a   :  { %v660_v61 = vmul.f32 %v644_v43, %v324_v33  ;;  %v707_v15 = vmul.f32 %v691_v49, %v675_v9  ;;  %v721_v43 = vld [vmem:[#allocation2 + $0x58] sm:$0xff] }
 0x13b   :  { %1117 = vmatprep.mubr.f32.mxu1 %v706_v46  ;;  %v661_v20 = vmul.f32 %v645_v42, %v325_v31  ;;  %v720_v42 = vld [vmem:[#allocation2 + $0x50] sm:$0xff]  ;;  %v723_v31 = vld [vmem:[#allocation2 + $0x68] sm:$0xff] }
 0x13c   :  { %v692_v48 = vadd.f32 1.0, %v660_v61 }
 0x13d   :  { %v693_v40 = vadd.f32 1.0, %v661_v20  ;;  %1118 = vmatmul.mubr.f32.gmra.mxu1 %v707_v15 }
 0x13e   :  { %v708_v29 = vmul.f32 %v692_v48, %v676_v19 }
 0x13f   :  { %v709_v23 = vmul.f32 %v693_v40, %v677_v18  ;;  %v725_v40 = vld [vmem:[#allocation2 + $0x78] sm:$0xff] }
 0x140   :  { %1120 = vmatprep.mubr.f32.mxu1 %v708_v29 }
 0x141   :  { %1121 = vmatmul.mubr.f32.gmra.mxu1 %v709_v23 }
 0x1da   :  { %v1101_v4 = vpop.f32.mrf.mxu0 }
 0x1db   :  { %v872_v0 = vadd.f32 %v1101_v4, %v711_v21  ;;  %v724_v21 = vld [vmem:[#allocation2 + $0x70] sm:$0xff] }
 0x1dc   :  { %v792_v52 = vpop.f32.mrf.mxu0 }
 0x1dd   :  { %888 = vst.msk [vmem:[#allocation2 + $0x8] sm:$0xff] %vm24_vm0, %v872_v0  ;;  %v871_v32 = vadd.f32 %v792_v52, %v710_v14 }
 0x1de   :  { %v1104_v27 = vpop.f32.mrf.mxu0 }
 0x1df   :  { %887 = vst.msk [vmem:[#allocation2] sm:$0xff] %vm24_vm0, %v871_v32  ;;  %v874_v39 = vadd.f32 %v1104_v27, %v713_v44 }
 0x1e0   :  { %v802_v30 = vpop.f32.mrf.mxu0 }
 0x1e1   :  { %890 = vst.msk [vmem:[#allocation2 + $0x18] sm:$0xff] %vm24_vm0, %v874_v39  ;;  %v873_v16 = vadd.f32 %v802_v30, %v712_v50 }
 0x1e2   :  { %v1107_v1 = vpop.f32.mrf.mxu0 }
 0x1e3   :  { %889 = vst.msk [vmem:[#allocation2 + $0x10] sm:$0xff] %vm24_vm0, %v873_v16  ;;  %v876_v59 = vadd.f32 %v1107_v1, %v715_v56 }
 0x1e4   :  { %v1110_v36 = vpop.f32.mrf.mxu1  ;;  %v907_v11 = vld [vmem:[#allocation2 + $0x8] sm:$0xff]  ;;  %v812_v57 = vpop.f32.mrf.mxu0 }
 0x1e5   :  { %v878_v63 = vadd.f32 %v1110_v36, %v717_v51  ;;  %v930_v37 = vadd.f32 %v1755_v17, %v907_v11  ;;  %892 = vst.msk [vmem:[#allocation2 + $0x28] sm:$0xff] %vm24_vm0, %v876_v59  ;;  %v875_v55 = vadd.f32 %v812_v57, %v714_v47 }
 0x1e6   :  { %v822_v28 = vpop.f32.mrf.mxu1  ;;  %v906_v3 = vld [vmem:[#allocation2] sm:$0xff] }
 0x1e7   :  { %894 = vst.msk [vmem:[#allocation2 + $0x38] sm:$0xff] %vm24_vm0, %v878_v63  ;;  %v877_v58 = vadd.f32 %v822_v28, %v716_v34  ;;  %946 = vst.msk [vmem:[%s1855_s5 + $0x8] sm:$0xff] %vm24_vm0, %v930_v37  ;;  %v929_v8 = vadd.f32 %v1755_v17, %v906_v3 }
 0x1e8   :  { %891 = vst.msk [vmem:[#allocation2 + $0x20] sm:$0xff] %vm24_vm0, %v875_v55  ;;  %v909_v25 = vld [vmem:[#allocation2 + $0x18] sm:$0xff] }
 0x1e9   :  { %893 = vst.msk [vmem:[#allocation2 + $0x30] sm:$0xff] %vm24_vm0, %v877_v58  ;;  %945 = vst.msk [vmem:[%s1855_s5] sm:$0xff] %vm24_vm0, %v929_v8  ;;  %v932_v7 = vadd.f32 %v1755_v17, %v909_v25 }
 0x1ea   :  { %v908_v24 = vld [vmem:[#allocation2 + $0x10] sm:$0xff] }
 0x1eb   :  { %948 = vst.msk [vmem:[%s1855_s5 + $0x18] sm:$0xff] %vm24_vm0, %v932_v7  ;;  %v931_v62 = vadd.f32 %v1755_v17, %v908_v24 }
 0x1ec   :  { %v911_v10 = vld [vmem:[#allocation2 + $0x28] sm:$0xff] }
 0x1ed   :  { %947 = vst.msk [vmem:[%s1855_s5 + $0x10] sm:$0xff] %vm24_vm0, %v931_v62  ;;  %v934_v2 = vadd.f32 %v1755_v17, %v911_v10 }
 0x1ee   :  { %v913_v53 = vld [vmem:[#allocation2 + $0x38] sm:$0xff] }
 0x1ef   :  { %v910_v35 = vld [vmem:[#allocation2 + $0x20] sm:$0xff]  ;;  %v936_v54 = vadd.f32 %v1755_v17, %v913_v53  ;;  %950 = vst.msk [vmem:[%s1855_s5 + $0x28] sm:$0xff] %vm24_vm0, %v934_v2 }
 0x1f0   :  { %v933_v5 = vadd.f32 %v1755_v17, %v910_v35  ;;  %v912_v22 = vld [vmem:[#allocation2 + $0x30] sm:$0xff] }
 0x1f1   :  { %952 = vst.msk [vmem:[%s1855_s5 + $0x38] sm:$0xff] %vm24_vm0, %v936_v54  ;;  %v935_v60 = vadd.f32 %v1755_v17, %v912_v22 }
 0x1f2   :  { %949 = vst.msk [vmem:[%s1855_s5 + $0x20] sm:$0xff] %vm24_vm0, %v933_v5 }
 0x1f3   :  { %951 = vst.msk [vmem:[%s1855_s5 + $0x30] sm:$0xff] %vm24_vm0, %v935_v60 }
 0x1f5   :  { %v1113_v26 = vpop.f32.mrf.mxu1 }
 0x1f6   :  { %v880_v41 = vadd.f32 %v1113_v26, %v719_v45 }
 0x1f7   :  { %v832_v49 = vpop.f32.mrf.mxu1 }
 0x1f8   :  { %896 = vst.msk [vmem:[#allocation2 + $0x48] sm:$0xff] %vm24_vm0, %v880_v41  ;;  %v879_v33 = vadd.f32 %v832_v49, %v718_v6 }
 0x1f9   :  { %v1116_v46 = vpop.f32.mrf.mxu1 }
 0x1fa   :  { %895 = vst.msk [vmem:[#allocation2 + $0x40] sm:$0xff] %vm24_vm0, %v879_v33  ;;  %v882_v13 = vadd.f32 %v1116_v46, %v721_v43 }
 0x1fb   :  { %v842_v9 = vpop.f32.mrf.mxu1 }
 0x1fc   :  { %898 = vst.msk [vmem:[#allocation2 + $0x58] sm:$0xff] %vm24_vm0, %v882_v13  ;;  %v881_v61 = vadd.f32 %v842_v9, %v720_v42 }
 0x1fd   :  { %v1119_v20 = vpop.f32.mrf.mxu1 }
 0x1fe   :  { %897 = vst.msk [vmem:[#allocation2 + $0x50] sm:$0xff] %vm24_vm0, %v881_v61  ;;  %v884_v19 = vadd.f32 %v1119_v20, %v723_v31 }
 0x1ff   :  { %v915_v15 = vld [vmem:[#allocation2 + $0x48] sm:$0xff]  ;;  %v852_v48 = vpop.f32.mrf.mxu1 }
 0x200   :  { %v938_v12 = vadd.f32 %v1755_v17, %v915_v15  ;;  %900 = vst.msk [vmem:[#allocation2 + $0x68] sm:$0xff] %vm24_vm0, %v884_v19  ;;  %v883_v18 = vadd.f32 %v852_v48, %v722_v38 }
 0x201   :  { %v914_v29 = vld [vmem:[#allocation2 + $0x40] sm:$0xff]  ;;  %v1122_v23 = vpop.f32.mrf.mxu1 }
 0x202   :  { %954 = vst.msk [vmem:[%s1855_s5 + $0x48] sm:$0xff] %vm24_vm0, %v938_v12  ;;  %v937_v4 = vadd.f32 %v1755_v17, %v914_v29  ;;  %899 = vst.msk [vmem:[#allocation2 + $0x60] sm:$0xff] %vm24_vm0, %v883_v18  ;;  %v886_v14 = vadd.f32 %v1122_v23, %v725_v40 }
 0x203   :  { %v917_v0 = vld [vmem:[#allocation2 + $0x58] sm:$0xff]  ;;  %v862_v52 = vpop.f32.mrf.mxu1 }
 0x204   :  { %953 = vst.msk [vmem:[%s1855_s5 + $0x40] sm:$0xff] %vm24_vm0, %v937_v4  ;;  %v940_v44 = vadd.f32 %v1755_v17, %v917_v0  ;;  %902 = vst.msk [vmem:[#allocation2 + $0x78] sm:$0xff] %vm24_vm0, %v886_v14  ;;  %v885_v32 = vadd.f32 %v862_v52, %v724_v21 }
 0x205   :  { %v916_v27 = vld [vmem:[#allocation2 + $0x50] sm:$0xff] }
 0x206   :  { %956 = vst.msk [vmem:[%s1855_s5 + $0x58] sm:$0xff] %vm24_vm0, %v940_v44  ;;  %v939_v50 = vadd.f32 %v1755_v17, %v916_v27  ;;  %901 = vst.msk [vmem:[#allocation2 + $0x70] sm:$0xff] %vm24_vm0, %v885_v32 }
 0x207   :  { %v919_v39 = vld [vmem:[#allocation2 + $0x68] sm:$0xff] }
 0x208   :  { %955 = vst.msk [vmem:[%s1855_s5 + $0x50] sm:$0xff] %vm24_vm0, %v939_v50  ;;  %v942_v30 = vadd.f32 %v1755_v17, %v919_v39 }
 0x209   :  { %v918_v56 = vld [vmem:[#allocation2 + $0x60] sm:$0xff] }
 0x20a   :  { %958 = vst.msk [vmem:[%s1855_s5 + $0x68] sm:$0xff] %vm24_vm0, %v942_v30  ;;  %v941_v16 = vadd.f32 %v1755_v17, %v918_v56 }
 0x20b   :  { %v921_v51 = vld [vmem:[#allocation2 + $0x78] sm:$0xff] }
 0x20c   :  { %957 = vst.msk [vmem:[%s1855_s5 + $0x60] sm:$0xff] %vm24_vm0, %v941_v16  ;;  %v944_v1 = vadd.f32 %v1755_v17, %v921_v51 }
 0x20d   :  { %v920_v47 = vld [vmem:[#allocation2 + $0x70] sm:$0xff] }
 0x20e   :  { %960 = vst.msk [vmem:[%s1855_s5 + $0x78] sm:$0xff] %vm24_vm0, %v944_v1  ;;  %v943_v59 = vadd.f32 %v1755_v17, %v920_v47 }
 0x210   :  { %959 = vst.msk [vmem:[%s1855_s5 + $0x70] sm:$0xff] %vm24_vm0, %v943_v59 }

</bundles_post_ra>
